<compile_context>
chip_gen: v6e
topology: v6e:2x2x1
jax: 0.10.0
libtpu: 0.0.40
codegen_flags: <defaults>
</compile_context>

<pallas_src>
import functools

import jax
import jax.numpy as jnp
from jax.experimental import pallas as pl
from jax.experimental.pallas import tpu as pltpu


def _round_up(a, b):
    return (a + b - 1) // b * b


def _focal_loss_kernel(x_ref, t_ref, out_ref, *, gamma, alpha, binary_targets):
    j = pl.program_id(1)  # sequential ("arbitrary") axis within this core's slice

    # Zero this core's resident partial-sum block on its first step.
    @pl.when(j == 0)
    def _():
        out_ref[...] = jnp.zeros_like(out_ref)

    x = x_ref[...].astype(jnp.float32)
    t = t_ref[...].astype(jnp.float32)

    # Numerically-stable BCE-with-logits (torch formulation):
    #   bce = relu(x) - x*t + log1p(exp(-|x|))
    e = jnp.exp(-jnp.abs(x))          # EUP #1
    softplus = jnp.log1p(e)           # EUP #2
    bce = jnp.maximum(x, 0.0) - x * t + softplus

    if binary_targets:
        # For t in {0,1}: exp(-bce) = exp(x*t - relu(x)) / (1 + e), and the
        # numerator is 1 when sign(x) "agrees" with the label, else exp(-|x|).
        # Saves one exp per element; approx reciprocal stays in the EUP slot.
        num = jnp.where((t > 0.5) == (x >= 0.0), 1.0, e)
        pt = num * pl.reciprocal(1.0 + e, approx=True)
    else:
        pt = jnp.exp(-bce)            # EUP #3 (exact for soft targets)

    # gamma is a Python int by default -> integer power lowers to VPU multiplies.
    focal = alpha * (1.0 - pt) ** gamma * bce          # (block_rows, W) f32

    # Fold onto the (8, W) accumulator: reshape only splits the sublane dim
    # (tile-preserving) and the sum(axis=0) is pure elementwise vreg adds (VPU),
    # which hide under the DMA.  No per-step XLU reduce, no SMEM round-trip.
    br, w = focal.shape
    part = focal.reshape(br // 8, 8, w).sum(axis=0)     # (8, W)
    out_ref[...] += part[None, :, :]


def focal_loss(inputs, targets, gamma=2, alpha=0.5, *,
               block_rows=1024, lane_width=512, n_cores=2,
               binary_targets=False):
    """Pallas equivalent of FocalLoss(gamma, alpha)(inputs, targets).

    inputs/targets: arrays of identical shape (any rank).  Targets may be a
    narrower dtype (bf16 / int8 {0,1}) to cut HBM traffic; they are upcast to
    f32 inside the kernel.  Returns an f32 scalar (mean focal loss).
    Set binary_targets=True only when targets are exactly {0,1} (faster EUP path).
    """
    assert inputs.shape == targets.shape
    assert lane_width % 128 == 0
    if isinstance(gamma, float) and float(gamma).is_integer():
        gamma = int(gamma)  # keep the power on the VPU (no exp/log pow)

    total = int(inputs.size)
    assert total > 0
    W = lane_width

    # Lane-dense repack: [.. any shape ..] -> [rows_padded, W].
    rows = -(-total // W)
    block_rows_eff = max(8, min(_round_up(block_rows, 8), _round_up(rows, 8)))
    rows_padded = _round_up(max(rows, 1), n_cores * block_rows_eff)
    n_steps = rows_padded // (n_cores * block_rows_eff)
    pad = rows_padded * W - total

    x = inputs.reshape(-1)
    t = targets.reshape(-1)
    if pad:
        # Pad with (logit=+100, target=1): BCE == 0 and pt == 1 in f32, so padded
        # elements contribute exactly 0 to the sum -> no in-kernel mask needed.
        x = jnp.concatenate([x, jnp.full((pad,), 100, dtype=x.dtype)])
        t = jnp.concatenate([t, jnp.full((pad,), 1, dtype=t.dtype)])
    x = x.reshape(rows_padded, W)
    t = t.reshape(rows_padded, W)

    kernel = functools.partial(_focal_loss_kernel, gamma=gamma, alpha=alpha,
                               binary_targets=binary_targets)

    in_map = lambda c, j: (c * n_steps + j, 0)

    partials = pl.pallas_call(
        kernel,
        out_shape=jax.ShapeDtypeStruct((n_cores, 8, W), jnp.float32),
        grid_spec=pltpu.PrefetchScalarGridSpec(
            num_scalar_prefetch=0,
            grid=(n_cores, n_steps),
            in_specs=[
                pl.BlockSpec((block_rows_eff, W), in_map),
                pl.BlockSpec((block_rows_eff, W), in_map),
            ],
            # Per-core partial-sum tile, resident in VMEM across the j axis.
            out_specs=pl.BlockSpec((1, 8, W), lambda c, j: (c, 0, 0)),
        ),
        compiler_params=pltpu.CompilerParams(
            dimension_semantics=("parallel", "arbitrary"),
            vmem_limit_bytes=32 * 1024 * 1024,
        ),
    )(x, t)

    # Tiny final reduction of the per-core (8, W) partials outside the kernel.
    return jnp.sum(partials) / jnp.float32(total)


def focal_loss_ref(inputs, targets, gamma=2, alpha=0.5):
    x = inputs.astype(jnp.float32)
    t = targets.astype(jnp.float32)
    bce = jnp.maximum(x, 0.0) - x * t + jnp.log1p(jnp.exp(-jnp.abs(x)))
    pt = jnp.exp(-bce)
    return jnp.mean(alpha * (1.0 - pt) ** gamma * bce)


if __name__ == "__main__":
    key = jax.random.PRNGKey(0)
    k1, k2, k3, k4 = jax.random.split(key, 4)

    # Small multi-label-tags setting; C deliberately not a multiple of 128 to
    # exercise the lane-dense repack + zero-contribution padding path.
    B, C = 16, 200
    logits = jax.random.normal(k1, (B, C), dtype=jnp.float32) * 2.0
    targets = (jax.random.uniform(k2, (B, C)) > 0.5).astype(jnp.float32)

    ref = focal_loss_ref(logits, targets, gamma=2, alpha=0.5)

    # Exact path (valid for soft targets as well).
    loss = jax.block_until_ready(focal_loss(logits, targets, gamma=2, alpha=0.5))
    assert jnp.allclose(loss, ref, rtol=1e-5, atol=1e-6), (loss, ref)

    # Binary-target fast path (fewer EUP transcendentals + approx reciprocal).
    loss_fast = jax.block_until_ready(
        focal_loss(logits, targets, gamma=2, alpha=0.5, binary_targets=True))
    assert jnp.allclose(loss_fast, ref, rtol=2e-3, atol=1e-5), (loss_fast, ref)

    # Second check: multi-step grid (n_steps > 1), bf16 targets (halved HBM bytes).
    B2, C2 = 1024, 300
    logits2 = jax.random.normal(k3, (B2, C2), dtype=jnp.float32) * 2.0
    targets2 = (jax.random.uniform(k4, (B2, C2)) > 0.5).astype(jnp.bfloat16)
    ref2 = focal_loss_ref(logits2, targets2, gamma=2, alpha=0.5)
    loss2 = jax.block_until_ready(
        focal_loss(logits2, targets2, gamma=2, alpha=0.5, block_rows=64))
    assert jnp.allclose(loss2, ref2, rtol=1e-5, atol=1e-6), (loss2, ref2)

    print("KERNEL_OK")
</pallas_src>

<mosaic_0001>
module attributes {stable_mosaic.version = 11 : i64} {
  func.func @_focal_loss_kernel(%arg0: i32, %arg1: i32, %arg2: memref<8x512xf32, #tpu.memory_space<vmem>>, %arg3: memref<8x512xf32, #tpu.memory_space<vmem>>, %arg4: memref<1x8x512xf32, #tpu.memory_space<vmem>>) attributes {dimension_semantics = [#tpu.dimension_semantics<parallel>, #tpu.dimension_semantics<arbitrary>], iteration_bounds = array<i64: 2, 1>, scalar_prefetch = 0 : i64, scratch_operands = 0 : i64, tpu.core_type = #tpu.core_type<tc>, window_params = [{transform_indices = @transform_0, window_bounds = array<i64: 8, 512>}, {transform_indices = @transform_1, window_bounds = array<i64: 8, 512>}, {transform_indices = @transform_2, window_bounds = array<i64: 1, 8, 512>}]} {
    %c0_i32 = arith.constant 0 : i32
    %0 = arith.cmpi eq, %arg1, %c0_i32 : i32
    %1 = arith.extui %0 : i1 to i32
    %c0_i32_0 = arith.constant 0 : i32
    %2 = arith.cmpi ne, %1, %c0_i32_0 : i32
    scf.if %2 {
      %cst_15 = arith.constant 0.000000e+00 : f32
      %30 = vector.broadcast %cst_15 : f32 to vector<1x8x512xf32>
      %c0_16 = arith.constant 0 : index
      %c0_17 = arith.constant 0 : index
      %c0_18 = arith.constant 0 : index
      %31 = vector.load %arg4[%c0_16, %c0_17, %c0_18] : memref<1x8x512xf32, #tpu.memory_space<vmem>>, vector<1x8x512xf32>
      tpu.vector_store %arg4[%c0_16, %c0_17, %c0_18], %30 {strides = array<i32>} : memref<1x8x512xf32, #tpu.memory_space<vmem>>, vector<1x8x512xf32>,
    } else {
    }
    %c0 = arith.constant 0 : index
    %c0_1 = arith.constant 0 : index
    %3 = vector.load %arg2[%c0, %c0_1] : memref<8x512xf32, #tpu.memory_space<vmem>>, vector<8x512xf32>
    %c0_2 = arith.constant 0 : index
    %c0_3 = arith.constant 0 : index
    %4 = vector.load %arg3[%c0_2, %c0_3] : memref<8x512xf32, #tpu.memory_space<vmem>>, vector<8x512xf32>
    %5 = math.absf %3 : vector<8x512xf32>
    %cst = arith.constant 0.000000e+00 : f32
    %6 = vector.broadcast %cst : f32 to vector<8x512xf32>
    %7 = arith.subf %6, %5 : vector<8x512xf32>
    %8 = math.exp %7 : vector<8x512xf32>
    %9 = math.log1p %8 : vector<8x512xf32>
    %cst_4 = arith.constant 0.000000e+00 : f32
    %10 = vector.broadcast %cst_4 : f32 to vector<8x512xf32>
    %11 = arith.maximumf %3, %10 : vector<8x512xf32>
    %12 = arith.mulf %3, %4 : vector<8x512xf32>
    %13 = arith.subf %11, %12 : vector<8x512xf32>
    %14 = arith.addf %13, %9 : vector<8x512xf32>
    %cst_5 = arith.constant 0.000000e+00 : f32
    %15 = vector.broadcast %cst_5 : f32 to vector<8x512xf32>
    %16 = arith.subf %15, %14 : vector<8x512xf32>
    %17 = math.exp %16 : vector<8x512xf32>
    %cst_6 = arith.constant 1.000000e+00 : f32
    %18 = vector.broadcast %cst_6 : f32 to vector<8x512xf32>
    %19 = arith.subf %18, %17 : vector<8x512xf32>
    %20 = arith.mulf %19, %19 : vector<8x512xf32>
    %cst_7 = arith.constant 5.000000e-01 : f32
    %21 = vector.broadcast %cst_7 : f32 to vector<8x512xf32>
    %22 = arith.mulf %21, %20 : vector<8x512xf32>
    %23 = arith.mulf %22, %14 : vector<8x512xf32>
    %24 = vector.shape_cast %23 : vector<8x512xf32> to vector<1x8x512xf32>
    %cst_8 = arith.constant dense<0.000000e+00> : vector<8x512xf32>
    %25 = vector.multi_reduction <add>, %24, %cst_8 [0] : vector<1x8x512xf32> to vector<8x512xf32>
    %c0_9 = arith.constant 0 : index
    %c0_10 = arith.constant 0 : index
    %c0_11 = arith.constant 0 : index
    %26 = vector.load %arg4[%c0_9, %c0_10, %c0_11] : memref<1x8x512xf32, #tpu.memory_space<vmem>>, vector<1x8x512xf32>
    %27 = vector.shape_cast %25 : vector<8x512xf32> to vector<1x8x512xf32>
    %28 = arith.addf %26, %27 : vector<1x8x512xf32>
    %c0_12 = arith.constant 0 : index
    %c0_13 = arith.constant 0 : index
    %c0_14 = arith.constant 0 : index
    %29 = vector.load %arg4[%c0_12, %c0_13, %c0_14] : memref<1x8x512xf32, #tpu.memory_space<vmem>>, vector<1x8x512xf32>
    tpu.vector_store %arg4[%c0_12, %c0_13, %c0_14], %28 {strides = array<i32>} : memref<1x8x512xf32, #tpu.memory_space<vmem>>, vector<1x8x512xf32>,
    return
  }
  func.func @transform_0(%arg0: i32, %arg1: i32) -> (i32, i32) {
    %c1_i32 = arith.constant 1 : i32
    %0 = arith.muli %arg0, %c1_i32 : i32
    %1 = arith.addi %0, %arg1 : i32
    %c0_i32 = arith.constant 0 : i32
    %c0_i32_0 = arith.constant 0 : i32
    return %1, %c0_i32 : i32, i32
  }
  func.func @transform_1(%arg0: i32, %arg1: i32) -> (i32, i32) {
    %c1_i32 = arith.constant 1 : i32
    %0 = arith.muli %arg0, %c1_i32 : i32
    %1 = arith.addi %0, %arg1 : i32
    %c0_i32 = arith.constant 0 : i32
    %c0_i32_0 = arith.constant 0 : i32
    return %1, %c0_i32 : i32, i32
  }
  func.func @transform_2(%arg0: i32, %arg1: i32) -> (i32, i32, i32) {
    %c0_i32 = arith.constant 0 : i32
    %c0_i32_0 = arith.constant 0 : i32
    %c0_i32_1 = arith.constant 0 : i32
    return %arg0, %c0_i32, %c0_i32_0 : i32, i32, i32
  }
}

</mosaic_0001>

<bundles_post_ra>
// kernel: tpu_custom_call.1
= control target key start
LH: loop header
LB: loop body
LE: loop exit
PB: predicated region body
PF: predicated region fallthrough
CT: control target
= control target key end

     0   :  { %7 = vsyncpa [#allocation3], 0  ;;  %s931_s0 = inlined_call_operand.hbm [shape: f32[16,512], index: 0, kind: input, shape index: {}]   ;;  %s932_s1 = inlined_call_operand.hbm [shape: f32[16,512], index: 1, kind: input, shape index: {}]   ;;  %s933_s2 = inlined_call_operand.hbm [shape: f32[2,8,512], index: 2, kind: output, shape index: {}]  }
   0x1   :  { %9 = vsyncpa [#allocation3 + $0x1], 0 }
   0x2   :  { %10 = vsyncpa [#allocation6], 0 }
   0x3   :  { %12 = vsyncpa [#allocation6 + $0x1], 0 }
   0x4   :  { %13 = vsyncpa [#allocation4], 0 }
   0x5   :  { %15 = vsyncpa [#allocation4 + $0x1], 0  ;;  %s738_s9 = smov 0   ;;  %s740_s10 = smov 0  }
   0x6   :  { %s742_s11 = smov 0   ;;  %s744_s12 = smov 0  }
   0x7   :  { %s746_s13 = smov 0   ;;  %s748_s14 = smov 0  }
   0x8 LB: > { %s464_s15 = sadd.s32 4294967295, %s718_s14   ;;  %s465_s16 = sadd.s32 4294967294, %s718_s14   ;;  %s718_s14 = sphi %s748_s14, %s21_s14   ;;  %s714_s13 = sphi %s746_s13, %s947_s13   ;;  %s710_s12 = sphi %s744_s12, %s946_s12   ;;  %s706_s11 = sphi %s742_s11, %s945_s11   ;;  %s702_s10 = sphi %s740_s10, %s944_s10   ;;  %s698_s9 = sphi %s738_s9, %s943_s9  }
   0x9   : > { %s33_s17 = sadd.s32 1, %s714_s13  ;;  %s42_s18 = sadd.s32 1, %s706_s11 }
   0xa   : > { %p35_p0 = scmp.ge.s32.totalorder %s33_s17, 2  ;;  %p49_p1 = scmp.ne.s32.totalorder %s706_s11, %s702_s10 }
   0xb   : > { %p50_p2 = scmp.eq.s32.totalorder %s718_s14, 0  ;;  %p55_p3 = scmp.ne.s32.totalorder %s702_s10, %s698_s9 }
   0xc   : > { %s949_s17 = smov (%p35_p0, %s33_s17), 0  ;;  %p56_p5 = scmp.eq.s32.totalorder %s464_s15, 0 }
   0xd   : > { %p779_p4 = por %p50_p2, %p49_p1  ;;  %s39_s20 = ssub.s32 %s714_s13, %s949_s17 }
   0xe   : > { %p107_p6 = scmp.eq.s32.totalorder %s464_s15, 1  ;;  %p40_p7 = scmp.eq.s32.totalorder %s39_s20, 0 }
   0xf   : > { %p785_p8 = por %p56_p5, %p55_p3  ;;  %p113_p10 = scmp.eq.s32.totalorder %s465_s16, 1 }
  0x10   : > { %p789_p9 = por %p107_p6, %p49_p1  ;;  %p503_p13 = scmp.lt.s32.totalorder %s718_s14, 2 }
  0x11   : > { %s794_s23 = scalar_select %p40_p7, %s706_s11, %s42_s18  }
  0x12   : > { %p796_p11 = por %p113_p10, %p55_p3  ;;  %s803_s25 = sand.u32 1, %s706_s11  }
  0x13   : > { %s468_s26 = sshll.u32 %s803_s25, 5  ;;  %s483_s27 = sshll.u32 %s714_s13, 9 }
  0x14   : > { %s144_s30 = scalar_lea.hbm %s931_s0, %s483_s27  ;;  %s137_s3 = scalar_lea.vmem [#allocation2], %s468_s26 }
  0x15   : > { %s146_s4 = sshll.u32 %s137_s3, 4  ;;  %p812_p0 = pnand %p503_p13, %p779_p4  ;;  %s147_s4 = int_to_ptr.vmem [resolvable:$true] %s146_s4 }
  0x16   : > { %p474_p1 = scmp.ge.s32.totalorder %s718_s14, 1  ;;  %p171_p2 = scmp.lt.s32.totalorder %s718_s14, 3 }
  0x17   : > { %s134_s6 = scalar_lea.sflag [#allocation3], %s803_s25  ;;  %p580_p3 = pneg %p812_p0 }
  0x18   : > { %s591_s7 = scalar_lea.vmem %s147_s4, 512  ;;  %s720_s8 = smov [#allocation2]  }
  0x19   : > { %p592_p5 = scmp.ne.s32.totalorder %s147_s4, %s591_s7  ;;  %s596_s15 = sshll.u32 %s720_s8, 4  ;;  %s597_s15 = int_to_ptr.vmem [resolvable:$false] %s596_s15 }
  0x1a   : > { %s598_s16 = scalar_lea.vmem %s597_s15, 1024  ;;  %p599_p4 = scmp.lt.s32.totalorder %s147_s4, %s597_s15 }
  0x1b   : > { %p594_p6 = pnand %p592_p5, %p580_p3  ;;  %p600_p10 = scmp.lt.s32.totalorder %s598_s16, %s591_s7 }
  0x1d   : > { %p595_p7 = pneg %p594_p6  ;;  %p601_p13 = por %p600_p10, %p599_p4 }
  0x1f   : > { %p602_p12 = pnand %p601_p13, %p595_p7 }
  0x21   : > { %605 = shalt.err (!%p602_p12)
}
  0x22   : > { %495 = dma.hbm_to_vmem [thread:$0]  (!%p812_p0), %s144_s30, 512, %s147_s4, %s134_s6  }
  0x23   : > { %p830_p5 = pnand %p474_p1, %p171_p2  ;;  %s164_s28 = scalar_lea.hbm %s932_s1, %s483_s27 }
  0x24   : > { %s157_s29 = scalar_lea.vmem [#allocation5], %s468_s26  ;;  %s154_s7 = scalar_lea.sflag [#allocation6], %s803_s25 }
  0x25   : > { %s166_s3 = sshll.u32 %s157_s29, 4  ;;  %s721_s30 = smov [#allocation5]   ;;  %s167_s3 = int_to_ptr.vmem [resolvable:$true] %s166_s3 }
  0x26   : > { %s619_s8 = scalar_lea.vmem %s167_s3, 512  ;;  %s624_s4 = sshll.u32 %s721_s30, 4  ;;  %s625_s4 = int_to_ptr.vmem [resolvable:$false] %s624_s4 }
  0x27   : > { %p620_p12 = scmp.ne.s32.totalorder %s167_s3, %s619_s8  ;;  %s626_s6 = scalar_lea.vmem %s625_s4, 1024 }
  0x28   : > { %p627_p1 = scmp.lt.s32.totalorder %s167_s3, %s625_s4  ;;  %p628_p2 = scmp.lt.s32.totalorder %s626_s6, %s619_s8 }
  0x29   : > { %p622_p6 = pnand %p620_p12, %p580_p3 }
  0x2a   : > { %p629_p4 = por %p628_p2, %p627_p1 }
  0x2b   : > { %p623_p7 = pneg %p622_p6 }
  0x2d   : > { %p630_p10 = pnand %p629_p4, %p623_p7 }
  0x2f   : > { %633 = shalt.err (!%p630_p10)
}
  0x30   : > { %498 = dma.hbm_to_vmem [thread:$0]  (!%p812_p0), %s164_s28, 512, %s167_s3, %s154_s7  }
  0x31   : > { %175 = sbr.rel (%p830_p5) target bundleno = 141 (0x8d), region = 28  ;;  %s846_s25 = sand.u32 (!%p830_p5), 1, %s702_s10  }
  0x32   : > { %s849_s26 = sshll.u32 (!%p830_p5), %s846_s25, 5  ;;  %s178_s27 = scalar_lea.sflag (!%p830_p5), [#allocation3], %s846_s25 }
  0x33   : > { %s181_s15 = scalar_lea.vmem (!%p830_p5), [#allocation2], %s849_s26 }
  0x36   : > { %685 = dma.done.wait (%p785_p8), %s178_s27, 512  }
  0x37   : > { %687 = vsyncadd (%p785_p8), %s178_s27, 4294966784  ;;  %s187_s5 = scalar_lea.sflag [#allocation6], %s846_s25  ;;  %s859_s16 = scalar_lea.vmem [#allocation5], %s849_s26 }
  0x38   : > { %689 = dma.done.wait (%p785_p8), %s187_s5, 512  }
  0x39   : > { %691 = vsyncadd (%p785_p8), %s187_s5, 4294966784  ;;  %v226_v0 = vld [vmem:[%s181_s15] sm:$0xff]  ;;  %v865_v1 = vld [vmem:[%s181_s15 + $0x8] sm:$0xff]  ;;  %s485_s21 = sshll.u32 %s710_s12, 9  ;;  %s215_s18 = scalar_lea.vmem [#allocation7], %s849_s26 }
  0x3a   : > { %v234_v2 = vand.u32 2147483647, %v226_v0  ;;  %v235_v3 = vand.u32 2147483647, %v865_v1  ;;  %v868_v4 = vld [vmem:[%s181_s15 + $0x10] sm:$0xff]  ;;  %v870_v5 = vld [vmem:[%s181_s15 + $0x18] sm:$0xff]  ;;  %s359_s29 = scalar_lea.hbm %s933_s2, %s485_s21 }
  0x3b   : > { %v236_v8 = vand.u32 2147483647, %v868_v4  ;;  %v237_v9 = vand.u32 2147483647, %v870_v5  ;;  %v230_v25 = vld [vmem:[%s859_s16] sm:$0xff]  ;;  %v231_v28 = vld [vmem:[%s859_s16 + $0x8] sm:$0xff] }
  0x3c   : > { %v238_v6 = vsub.f32 0.0, %v234_v2  ;;  %v239_v7 = vsub.f32 0.0, %v235_v3  ;;  %v286_v30 = vmax.f32 %v226_v0, 0.0  ;;  %v290_v31 = vmul.f32 %v230_v25, %v226_v0  ;;  %v232_v32 = vld [vmem:[%s859_s16 + $0x10] sm:$0xff]  ;;  %v233_v40 = vld [vmem:[%s859_s16 + $0x18] sm:$0xff]  ;;  %s361_s19 = sshll.u32 %s215_s18, 4  ;;  %s362_s19 = int_to_ptr.vmem [resolvable:$true] %s361_s19 }
  0x3d   : > { %v240_v12 = vsub.f32 0.0, %v236_v8  ;;  %v241_v13 = vsub.f32 0.0, %v237_v9  ;;  %v287_v37 = vmax.f32 %v865_v1, 0.0  ;;  %v291_v38 = vmul.f32 %v231_v28, %v865_v1  ;;  %s347_s3 = scalar_lea.sflag [#allocation4], %s846_s25  ;;  %s634_s7 = scalar_lea.vmem %s362_s19, 512 }
  0x3e   : > { %v242_v10 = vmul.f32 1.442695, %v238_v6  ;;  %v244_v11 = vmul.f32 1.442695, %v239_v7  ;;  %v288_v42 = vmax.f32 %v868_v4, 0.0  ;;  %v292_v43 = vmul.f32 %v232_v32, %v868_v4  ;;  %p635_p8 = scmp.ne.s32.totalorder %s362_s19, %s634_s7  ;;  %s722_s8 = smov [#allocation7]  }
  0x3f   : > { %v246_v14 = vmul.f32 1.442695, %v240_v12  ;;  %v248_v15 = vmul.f32 1.442695, %v241_v13  ;;  %v294_v45 = vsub.f32 %v286_v30, %v290_v31  ;;  %v289_v47 = vmax.f32 %v870_v5, 0.0  ;;  %s638_s12 = sshll.u32 %s722_s8, 4  ;;  %s639_s12 = int_to_ptr.vmem [resolvable:$false] %s638_s12 }
  0x40   : > { %554 = vpow2.f32 %v242_v10  ;;  %v293_v52 = vmul.f32 %v233_v40, %v870_v5  ;;  %v295_v55 = vsub.f32 %v287_v37, %v291_v38  ;;  %v296_v59 = vsub.f32 %v288_v42, %v292_v43  ;;  %p636_p0 = pnand %p635_p8, %p789_p9  ;;  %s640_s30 = scalar_lea.vmem %s639_s12, 1024 }
  0x41   : > { %556 = vpow2.f32 %v244_v11  ;;  %p641_p13 = scmp.lt.s32.totalorder %s362_s19, %s639_s12  ;;  %p642_p5 = scmp.lt.s32.totalorder %s640_s30, %s634_s7 }
  0x42   : > { %558 = vpow2.f32 %v246_v14  ;;  %v297_v2 = vsub.f32 %v289_v47, %v293_v52  ;;  %p637_p3 = pneg %p636_p0 }
  0x43   : > { %560 = vpow2.f32 %v248_v15  ;;  %p643_p12 = por %p642_p5, %p641_p13 }
  0x45   : > { %p644_p6 = pnand %p643_p12, %p637_p3 }
  0x4d   : > { %v555_v16 = vpop.eup %554 }
  0x4e   : > { %v557_v17 = vpop.eup %556  ;;  %v250_v18 = vadd.f32 1.0, %v555_v16  ;;  %v253_v24 = vmul.f32 -0.5, %v555_v16  ;;  %v256_v34 = vand.u32 2147483647, %v555_v16 }
  0x4f   : > { %v559_v19 = vpop.eup %558  ;;  %v259_v20 = vadd.f32 1.0, %v557_v17  ;;  %v262_v26 = vmul.f32 -0.5, %v557_v17  ;;  %v265_v36 = vand.u32 2147483647, %v557_v17 }
  0x50   : > { %v561_v21 = vpop.eup %560  ;;  %562 = vlog2.f32 %v250_v18  ;;  %v268_v22 = vadd.f32 1.0, %v559_v19  ;;  %v271_v27 = vmul.f32 -0.5, %v559_v19  ;;  %v254_v29 = vadd.f32 1.0, %v253_v24 }
  0x51   : > { %564 = vlog2.f32 %v259_v20  ;;  %v277_v23 = vadd.f32 1.0, %v561_v21  ;;  %v280_v33 = vmul.f32 -0.5, %v561_v21  ;;  %v263_v35 = vadd.f32 1.0, %v262_v26 }
  0x52   : > { %566 = vlog2.f32 %v268_v22  ;;  %v272_v39 = vadd.f32 1.0, %v271_v27  ;;  %v274_v41 = vand.u32 2147483647, %v559_v19  ;;  %v255_v44 = vmul.f32 %v555_v16, %v254_v29 }
  0x53   : > { %568 = vlog2.f32 %v277_v23  ;;  %v281_v46 = vadd.f32 1.0, %v280_v33  ;;  %vm883_vm0 = vcmp.lt.f32.partialorder %v256_v34, 0.0004427343  ;;  %v264_v50 = vmul.f32 %v557_v17, %v263_v35 }
  0x54   : > { %v283_v51 = vand.u32 2147483647, %v561_v21  ;;  %vm266_vm1 = vcmp.lt.f32.partialorder %v265_v36, 0.0004427343  ;;  %v273_v56 = vmul.f32 %v559_v19, %v272_v39  ;;  %vm275_vm2 = vcmp.lt.f32.partialorder %v274_v41, 0.0004427343 }
  0x55   : > { %v282_v62 = vmul.f32 %v561_v21, %v281_v46 }
  0x56   : > { %vm284_vm3 = vcmp.lt.f32.partialorder %v283_v51, 0.0004427343 }
  0x5d   : > { %v563_v48 = vpop.eup %562 }
  0x5e   : > { %v565_v53 = vpop.eup %564  ;;  %v252_v54 = vmul.f32 0.6931472, %v563_v48 }
  0x5f   : > { %v567_v57 = vpop.eup %566  ;;  %v261_v58 = vmul.f32 0.6931472, %v565_v53 }
  0x60   : > { %v258_v60 = vsel %vm883_vm0, %v255_v44, %v252_v54  ;;  %v270_v61 = vmul.f32 0.6931472, %v567_v57  ;;  %v569_v63 = vpop.eup %568 }
  0x61   : > { %v298_v0 = vadd.f32 %v294_v45, %v258_v60  ;;  %v267_v1 = vsel %vm266_vm1, %v264_v50, %v261_v58  ;;  %v279_v5 = vmul.f32 0.6931472, %v569_v63 }
  0x62   : > { %v299_v3 = vadd.f32 %v295_v55, %v267_v1  ;;  %v276_v4 = vsel %vm275_vm2, %v273_v56, %v270_v61 }
  0x63   : > { %v302_v6 = vsub.f32 0.0, %v298_v0  ;;  %v300_v7 = vadd.f32 %v296_v59, %v276_v4  ;;  %v285_v9 = vsel %vm284_vm3, %v282_v62, %v279_v5 }
  0x64   : > { %v303_v8 = vsub.f32 0.0, %v299_v3  ;;  %v301_v12 = vadd.f32 %v297_v2, %v285_v9 }
  0x65   : > { %v306_v10 = vmul.f32 1.442695, %v302_v6  ;;  %v304_v11 = vsub.f32 0.0, %v300_v7 }
  0x66   : > { %v308_v13 = vmul.f32 1.442695, %v303_v8  ;;  %v305_v15 = vsub.f32 0.0, %v301_v12 }
  0x67   : > { %570 = vpow2.f32 %v306_v10  ;;  %v310_v14 = vmul.f32 1.442695, %v304_v11 }
  0x68   : > { %572 = vpow2.f32 %v308_v13  ;;  %v312_v16 = vmul.f32 1.442695, %v305_v15 }
  0x69   : > { %574 = vpow2.f32 %v310_v14 }
  0x6a   : > { %576 = vpow2.f32 %v312_v16 }
  0x74   : > { %v571_v17 = vpop.eup %570 }
  0x75   : > { %v573_v18 = vpop.eup %572  ;;  %v314_v19 = vsub.f32 1.0, %v571_v17 }
  0x76   : > { %v575_v20 = vpop.eup %574  ;;  %v315_v21 = vsub.f32 1.0, %v573_v18 }
  0x77   : > { %v318_v22 = vmul.f32 %v314_v19, %v314_v19  ;;  %v316_v23 = vsub.f32 1.0, %v575_v20  ;;  %v577_v24 = vpop.eup %576 }
  0x78   : > { %v319_v25 = vmul.f32 %v315_v21, %v315_v21  ;;  %v317_v28 = vsub.f32 1.0, %v577_v24 }
  0x79   : > { %v322_v26 = vmul.f32 0.5, %v318_v22  ;;  %v320_v27 = vmul.f32 %v316_v23, %v316_v23 }
  0x7a   : > { %v323_v29 = vmul.f32 0.5, %v319_v25  ;;  %v321_v32 = vmul.f32 %v317_v28, %v317_v28 }
  0x7b   : > { %v326_v30 = vmul.f32 %v322_v26, %v298_v0  ;;  %v324_v31 = vmul.f32 0.5, %v320_v27 }
  0x7c   : > { %v327_v33 = vmul.f32 %v323_v29, %v299_v3  ;;  %v325_v35 = vmul.f32 0.5, %v321_v32 }
  0x7d   : > { %v328_v34 = vmul.f32 %v324_v31, %v300_v7  ;;  %342 = vst [vmem:[%s215_s18] sm:$0xff] %v326_v30 }
  0x7e   : > { %v329_v36 = vmul.f32 %v325_v35, %v301_v12  ;;  %343 = vst [vmem:[%s215_s18 + $0x8] sm:$0xff] %v327_v33 }
  0x7f   : > { %344 = vst [vmem:[%s215_s18 + $0x10] sm:$0xff] %v328_v34 }
  0x80   : > { %345 = vst [vmem:[%s215_s18 + $0x18] sm:$0xff] %v329_v36 }
  0x81   : > { %647 = shalt.err (!%p644_p6)
}
  0x82   : > { %s648_s4 = scalar_lea.hbm %s359_s29, 512  ;;  %s652_s26 = scalar_lea.hbm %s933_s2, 1024 }
  0x83   : > { %p649_p7 = scmp.ne.s32.totalorder %s359_s29, %s648_s4  ;;  %p653_p4 = scmp.lt.s32.totalorder %s359_s29, %s933_s2 }
  0x84   : > { %p654_p10 = scmp.lt.s32.totalorder %s652_s26, %s648_s4 }
  0x85   : > { %p650_p1 = pnand %p649_p7, %p789_p9 }
  0x86   : > { %p655_p8 = por %p654_p10, %p653_p4 }
  0x87   : > { %p651_p2 = pneg %p650_p1 }
  0x89   : > { %p656_p0 = pnand %p655_p8, %p651_p2 }
  0x8b   : > { %659 = shalt.err (!%p656_p0)
}
  0x8c   : > { %490 = dma.vmem_to_hbm [thread:$0]  (%p789_p9), %s362_s19, 512, %s359_s29, %s347_s3  }
  0x8d PF: > { %s373_s5 = sand.u32 1, %s698_s9   ;;  %p942_p3 = scmp.ge.s32.totalorder %s718_s14, 2 }
  0x8e   : > { %s374_s16 = scalar_lea.sflag [#allocation4], %s373_s5 }
  0x8f   : > { %p500_p13 = pnand %p942_p3, %p796_p11 }
  0x91   : > { %p501_p5 = pneg %p500_p13 }
  0x93   : > { %693 = dma.done.wait (%p501_p5), %s374_s16, 512  }
  0x94   : > { %695 = vsyncadd (%p501_p5), %s374_s16, 4294966784  ;;  %s21_s14 = sadd.s32 1, %s718_s14   ;;  %s943_s9 = smov %s702_s10 }
  0x95   : > { %p18_p12 = scmp.ge.s32.totalorder %s21_s14, 4   ;;  %s944_s10 = smov %s706_s11 }
  0x96   : > { %s945_s11 = smov %s794_s23  ;;  %s946_s12 = smov %s714_s13 }
  0x97   : > { %s947_s13 = smov %s949_s17  ;;  %20 = sbr.rel (!%p18_p12) target bundleno = 8 (0x8), region = 90 }
  0x9c   :  { %379 = vsyncpa [#allocation3], 1 }
  0x9d   :  { %381 = vsyncpa [#allocation3 + $0x1], 1 }
  0x9e   :  { %382 = vsyncpa [#allocation6], 1 }
  0x9f   :  { %384 = vsyncpa [#allocation6 + $0x1], 1 }
  0xa0   :  { %385 = vsyncpa [#allocation4], 1 }
  0xa1   :  { %387 = vsyncpa [#allocation4 + $0x1], 1 }

</bundles_post_ra>
